<compile_context>
chip_gen: v7x
topology: tpu7x:2x2x1
jax: 0.10.0
libtpu: 0.0.40
codegen_flags: <defaults>
</compile_context>

<pallas_src>
import functools

import jax
import jax.numpy as jnp
from jax.experimental import pallas as pl
from jax.experimental.pallas import tpu as pltpu

_LANE = 128
_EPS = 1e-8
# VMEM bytes one grid step may consume per x element: double-buffered input +
# double-buffered output (input dtype) + ~3 f32-sized in-kernel temporaries.
_F32_TEMPS_PER_ELEM = 12


def _vmem_capacity_bytes():
    try:
        cap = int(pltpu.get_tpu_info().vmem_capacity_bytes)
        if cap > 0:
            return cap
    except Exception:
        pass
    return 64 * 1024 * 1024  # v7x-sized fallback (most restrictive)


def _num_tensorcores_per_device():
    """TensorCores a single Pallas grid can be sharded over (megacore)."""
    try:
        kind = jax.devices()[0].device_kind.lower()
    except Exception:
        return 1
    return 2 if any(tag in kind for tag in ("v7", "v4", "v5p")) else 1


# ----------------------------------------------------------------------------
# Fused single-pass kernel: whole (C, T) rows resident, tb batch rows / step.
# ----------------------------------------------------------------------------
def _grn_fused_kernel(x_ref, gamma_ref, beta_ref, o_ref, *, inv_t):
    # x_ref/o_ref: (tb, C, T); gamma_ref/beta_ref: (C, 1)
    x = x_ref[...].astype(jnp.float32)
    gx = jnp.sqrt(jnp.sum(x * x, axis=1, keepdims=True))        # (tb, 1, T)
    gsum = jnp.sum(gx, axis=-1, keepdims=True)                   # (tb, 1, 1)
    inv = 1.0 / (gsum * inv_t + _EPS)                            # 1/(mean+eps), 1 per row
    nx = gx * inv                                                 # (tb, 1, T)
    gamma = gamma_ref[...].astype(jnp.float32)                    # (C, 1) -> bcast
    beta = beta_ref[...].astype(jnp.float32)
    o_ref[...] = (gamma * (x * nx) + beta + x).astype(o_ref.dtype)


def _grn_fused(x, gamma2d, beta2d, tb, vmem_limit):
    B, C, T = x.shape
    kernel = functools.partial(_grn_fused_kernel, inv_t=1.0 / T)
    return pl.pallas_call(
        kernel,
        out_shape=jax.ShapeDtypeStruct((B, C, T), x.dtype),
        grid_spec=pltpu.PrefetchScalarGridSpec(
            num_scalar_prefetch=0,
            grid=(pl.cdiv(B, tb),),
            in_specs=[
                pl.BlockSpec((tb, C, T), lambda b: (b, 0, 0)),
                pl.BlockSpec((C, 1), lambda b: (0, 0)),
                pl.BlockSpec((C, 1), lambda b: (0, 0)),
            ],
            out_specs=pl.BlockSpec((tb, C, T), lambda b: (b, 0, 0)),
        ),
        compiler_params=pltpu.CompilerParams(
            dimension_semantics=("parallel",),
            vmem_limit_bytes=vmem_limit,
        ),
    )(x, gamma2d, beta2d)


# ----------------------------------------------------------------------------
# Two-pass T-tiled path: rows too long for a per-row VMEM slab, or tiny-batch
# shapes on 2-TensorCore chips where T-tiling keeps both cores streaming.
# ----------------------------------------------------------------------------
def _grn_gx_kernel(x_ref, gx_ref):
    # x_ref: (1, C, tt) -> gx_ref: (1, 1, tt); per-column reduce, so garbage in
    # the ragged tail columns never leaks into valid columns.
    x = x_ref[...].astype(jnp.float32)
    gx_ref[...] = jnp.sqrt(jnp.sum(x * x, axis=1, keepdims=True))


def _grn_apply_kernel(x_ref, nx_ref, gamma_ref, beta_ref, o_ref):
    # x_ref: (1, C, tt); nx_ref: (1, 1, tt) f32; gamma/beta: (C, 1)
    x = x_ref[...].astype(jnp.float32)
    nx = nx_ref[...]
    gamma = gamma_ref[...].astype(jnp.float32)
    beta = beta_ref[...].astype(jnp.float32)
    o_ref[...] = (gamma * (x * nx) + beta + x).astype(o_ref.dtype)


def _grn_two_pass(x, gamma2d, beta2d, tt, vmem_limit):
    B, C, T = x.shape
    n_t = pl.cdiv(T, tt)
    cparams = pltpu.CompilerParams(
        dimension_semantics=("parallel", "parallel"),
        vmem_limit_bytes=vmem_limit,
    )

    # Pass 1: Gx = ||x||_2 over channels, T-tiled.
    gx = pl.pallas_call(
        _grn_gx_kernel,
        out_shape=jax.ShapeDtypeStruct((B, 1, T), jnp.float32),
        grid_spec=pltpu.PrefetchScalarGridSpec(
            num_scalar_prefetch=0,
            grid=(B, n_t),
            in_specs=[pl.BlockSpec((1, C, tt), lambda b, t: (b, 0, t))],
            out_specs=pl.BlockSpec((1, 1, tt), lambda b, t: (b, 0, t)),
        ),
        compiler_params=cparams,
    )(x)

    # Per-row mean/normalization computed ONCE on the tiny (B, 1, T) Gx array
    # (~1/C of x's traffic) instead of per T-tile inside pass 2.
    nx = gx / (jnp.mean(gx, axis=-1, keepdims=True) + _EPS)      # (B, 1, T) f32

    # Pass 2: re-read x tiles + the matching Nx tile, apply GRN.
    return pl.pallas_call(
        _grn_apply_kernel,
        out_shape=jax.ShapeDtypeStruct((B, C, T), x.dtype),
        grid_spec=pltpu.PrefetchScalarGridSpec(
            num_scalar_prefetch=0,
            grid=(B, n_t),
            in_specs=[
                pl.BlockSpec((1, C, tt), lambda b, t: (b, 0, t)),
                pl.BlockSpec((1, 1, tt), lambda b, t: (b, 0, t)),
                pl.BlockSpec((C, 1), lambda b, t: (0, 0)),
                pl.BlockSpec((C, 1), lambda b, t: (0, 0)),
            ],
            out_specs=pl.BlockSpec((1, C, tt), lambda b, t: (b, 0, t)),
        ),
        compiler_params=cparams,
    )(x, nx, gamma2d, beta2d)


# ----------------------------------------------------------------------------
# Public wrapper.
# ----------------------------------------------------------------------------
def grn_pallas(x, gamma, beta, *, vmem_limit_bytes=None, force_two_pass=False,
               tile_t=None):
    """GRN forward. x: (B, C, T); gamma, beta: (1, C, 1). Returns (B, C, T)."""
    B, C, T = x.shape
    itemsize = jnp.dtype(x.dtype).itemsize
    gamma2d = jnp.reshape(gamma, (C, 1))
    beta2d = jnp.reshape(beta, (C, 1))

    if vmem_limit_bytes is None:
        cap = _vmem_capacity_bytes()
        # 96 MiB on 128 MiB parts (v5e/v6e); 48 MiB on v7x's 64 MiB VMEM.
        vmem_limit = min(96 * 1024 * 1024, (3 * cap) // 4)
    else:
        vmem_limit = int(vmem_limit_bytes)
    step_budget = max(1 << 20, vmem_limit - (4 << 20))   # headroom for compiler scratch

    per_elem = 4 * itemsize + _F32_TEMPS_PER_ELEM         # dbl-buffered in+out + f32 temps
    row_cost = C * T * per_elem                            # one (C, T) row per step
    n_tc = _num_tensorcores_per_device()

    use_two_pass = force_two_pass or row_cost > step_budget
    # On a 2-TensorCore chip a single fused grid step (B == 1) would leave one
    # core idle; T-tiling at ~1.5x traffic on both cores wins for real rows.
    if n_tc > 1 and B == 1 and C * T * itemsize >= (2 << 20):
        use_two_pass = True

    if not use_two_pass:
        # As many batch rows per step as the VMEM budget allows.
        tb = max(1, min(B, step_budget // max(1, row_cost)))
        if n_tc > 1:
            # Expose enough grid steps that every TensorCore gets work
            # (ideally >= 2 steps per core for DMA/compute pipelining).
            if B >= 2 * n_tc:
                tb = min(tb, pl.cdiv(B, 2 * n_tc))
            else:
                tb = min(tb, pl.cdiv(B, min(B, n_tc)))
        return _grn_fused(x, gamma2d, beta2d, tb, vmem_limit)

    # Two-pass T-tiled path; tiles are multiples of 128 lanes, ragged tail
    # handled by Pallas partial-block masking (no wrapper pad/slice).
    if tile_t is not None:
        tt = max(_LANE, (int(tile_t) // _LANE) * _LANE)
    else:
        tt = max(_LANE, (step_budget // max(1, C * per_elem)) // _LANE * _LANE)
    tt = min(tt, pl.cdiv(T, _LANE) * _LANE)
    return _grn_two_pass(x, gamma2d, beta2d, tt, vmem_limit)


def grn_reference(x, gamma, beta):
    """Pure-JAX reference mirroring the PyTorch forward."""
    gx = jnp.sqrt(jnp.sum(x * x, axis=1, keepdims=True))         # (B, 1, T)
    nx = gx / (jnp.mean(gx, axis=-1, keepdims=True) + _EPS)      # (B, 1, T)
    return gamma * (x * nx) + beta + x


if __name__ == "__main__":
    key = jax.random.PRNGKey(0)
    k1, k2, k3, k4 = jax.random.split(key, 4)

    # Case 1: small module-like shapes -> fused single-pass path.
    B, C, T = 2, 4, 16
    x = jax.random.normal(k1, (B, C, T), dtype=jnp.float32)
    # nn.Parameter(torch.zeros(...)) in __init__; use small non-zero values so
    # the normalization path is actually exercised.
    gamma = 0.1 * jax.random.normal(k2, (1, C, 1), dtype=jnp.float32)
    beta = 0.1 * jax.random.normal(k3, (1, C, 1), dtype=jnp.float32)

    out = jax.block_until_ready(grn_pallas(x, gamma, beta))
    ref = grn_reference(x, gamma, beta)
    assert out.shape == (B, C, T)
    assert jnp.allclose(out, ref, atol=1e-5, rtol=1e-5), "fused path mismatch"

    # Case 2: ragged T (not a multiple of 128), forced through the two-pass
    # T-tiled path with 128-wide tiles (exercises partial tail blocks).
    B2, C2, T2 = 2, 8, 300
    x2 = jax.random.normal(k4, (B2, C2, T2), dtype=jnp.float32)
    gamma2 = 0.1 * jax.random.normal(k2, (1, C2, 1), dtype=jnp.float32)
    beta2 = 0.1 * jax.random.normal(k3, (1, C2, 1), dtype=jnp.float32)

    out2 = jax.block_until_ready(
        grn_pallas(x2, gamma2, beta2, force_two_pass=True, tile_t=128))
    ref2 = grn_reference(x2, gamma2, beta2)
    assert out2.shape == (B2, C2, T2)
    assert jnp.allclose(out2, ref2, atol=1e-5, rtol=1e-5), "two-pass path mismatch"

    # Case 3: same ragged-T input through the fused path (full-T blocks, no
    # wrapper pad/slice).
    out3 = jax.block_until_ready(grn_pallas(x2, gamma2, beta2))
    assert out3.shape == (B2, C2, T2)
    assert jnp.allclose(out3, ref2, atol=1e-5, rtol=1e-5), "fused ragged-T mismatch"

    print("KERNEL_OK")
</pallas_src>

<mosaic_0001>
module attributes {stable_mosaic.version = 11 : i64} {
  func.func @_grn_fused_kernel(%arg0: i32, %arg1: memref<2x4x16xf32, #tpu.memory_space<vmem>>, %arg2: memref<4x1xf32, #tpu.memory_space<vmem>>, %arg3: memref<4x1xf32, #tpu.memory_space<vmem>>, %arg4: memref<2x4x16xf32, #tpu.memory_space<vmem>>) attributes {dimension_semantics = [#tpu.dimension_semantics<parallel>], iteration_bounds = array<i64: 1>, scalar_prefetch = 0 : i64, scratch_operands = 0 : i64, tpu.core_type = #tpu.core_type<tc>, window_params = [{transform_indices = @transform_0, window_bounds = array<i64: 2, 4, 16>}, {pipeline_mode = #tpu.pipeline_mode<synchronous>, transform_indices = @transform_1, window_bounds = array<i64: 4, 1>}, {pipeline_mode = #tpu.pipeline_mode<synchronous>, transform_indices = @transform_2, window_bounds = array<i64: 4, 1>}, {transform_indices = @transform_3, window_bounds = array<i64: 2, 4, 16>}]} {
    %c0 = arith.constant 0 : index
    %c0_0 = arith.constant 0 : index
    %c0_1 = arith.constant 0 : index
    %0 = vector.load %arg1[%c0, %c0_0, %c0_1] : memref<2x4x16xf32, #tpu.memory_space<vmem>>, vector<2x4x16xf32>
    %1 = arith.mulf %0, %0 : vector<2x4x16xf32>
    %cst = arith.constant dense<0.000000e+00> : vector<2x16xf32>
    %2 = vector.multi_reduction <add>, %1, %cst [1] : vector<2x4x16xf32> to vector<2x16xf32>
    %3 = vector.shape_cast %2 : vector<2x16xf32> to vector<2x1x16xf32>
    %4 = math.sqrt %3 : vector<2x1x16xf32>
    %cst_2 = arith.constant dense<0.000000e+00> : vector<2x1xf32>
    %5 = vector.multi_reduction <add>, %4, %cst_2 [2] : vector<2x1x16xf32> to vector<2x1xf32>
    %6 = vector.shape_cast %5 : vector<2x1xf32> to vector<2x1x1xf32>
    %cst_3 = arith.constant 6.250000e-02 : f32
    %7 = vector.broadcast %cst_3 : f32 to vector<2x1x1xf32>
    %8 = arith.mulf %6, %7 : vector<2x1x1xf32>
    %cst_4 = arith.constant 9.99999993E-9 : f32
    %9 = vector.broadcast %cst_4 : f32 to vector<2x1x1xf32>
    %10 = arith.addf %8, %9 : vector<2x1x1xf32>
    %cst_5 = arith.constant 1.000000e+00 : f32
    %11 = vector.broadcast %cst_5 : f32 to vector<2x1x1xf32>
    %12 = arith.divf %11, %10 : vector<2x1x1xf32>
    %13 = vector.broadcast %12 : vector<2x1x1xf32> to vector<2x1x16xf32>
    %14 = arith.mulf %4, %13 : vector<2x1x16xf32>
    %c0_6 = arith.constant 0 : index
    %c0_7 = arith.constant 0 : index
    %15 = vector.load %arg2[%c0_6, %c0_7] : memref<4x1xf32, #tpu.memory_space<vmem>>, vector<4x1xf32>
    %c0_8 = arith.constant 0 : index
    %c0_9 = arith.constant 0 : index
    %16 = vector.load %arg3[%c0_8, %c0_9] : memref<4x1xf32, #tpu.memory_space<vmem>>, vector<4x1xf32>
    %17 = vector.broadcast %14 : vector<2x1x16xf32> to vector<2x4x16xf32>
    %18 = arith.mulf %0, %17 : vector<2x4x16xf32>
    %19 = vector.shape_cast %15 : vector<4x1xf32> to vector<1x4x1xf32>
    %20 = vector.broadcast %19 : vector<1x4x1xf32> to vector<2x4x16xf32>
    %21 = arith.mulf %20, %18 : vector<2x4x16xf32>
    %22 = vector.shape_cast %16 : vector<4x1xf32> to vector<1x4x1xf32>
    %23 = vector.broadcast %22 : vector<1x4x1xf32> to vector<2x4x16xf32>
    %24 = arith.addf %21, %23 : vector<2x4x16xf32>
    %25 = arith.addf %24, %0 : vector<2x4x16xf32>
    %c0_10 = arith.constant 0 : index
    %c0_11 = arith.constant 0 : index
    %c0_12 = arith.constant 0 : index
    %26 = vector.load %arg4[%c0_10, %c0_11, %c0_12] : memref<2x4x16xf32, #tpu.memory_space<vmem>>, vector<2x4x16xf32>
    tpu.vector_store %arg4[%c0_10, %c0_11, %c0_12], %25 {strides = array<i32>} : memref<2x4x16xf32, #tpu.memory_space<vmem>>, vector<2x4x16xf32>,
    return
  }
  func.func @transform_0(%arg0: i32) -> (i32, i32, i32) {
    %c0_i32 = arith.constant 0 : i32
    %c0_i32_0 = arith.constant 0 : i32
    %c0_i32_1 = arith.constant 0 : i32
    return %arg0, %c0_i32, %c0_i32_0 : i32, i32, i32
  }
  func.func @transform_1(%arg0: i32) -> (i32, i32) {
    %c0_i32 = arith.constant 0 : i32
    %c0_i32_0 = arith.constant 0 : i32
    %c0_i32_1 = arith.constant 0 : i32
    return %c0_i32, %c0_i32_0 : i32, i32
  }
  func.func @transform_2(%arg0: i32) -> (i32, i32) {
    %c0_i32 = arith.constant 0 : i32
    %c0_i32_0 = arith.constant 0 : i32
    %c0_i32_1 = arith.constant 0 : i32
    return %c0_i32, %c0_i32_0 : i32, i32
  }
  func.func @transform_3(%arg0: i32) -> (i32, i32, i32) {
    %c0_i32 = arith.constant 0 : i32
    %c0_i32_0 = arith.constant 0 : i32
    %c0_i32_1 = arith.constant 0 : i32
    return %arg0, %c0_i32, %c0_i32_0 : i32, i32, i32
  }
}

</mosaic_0001>

<bundles_post_ra>
// kernel: tpu_custom_call.1
= control target key start
LH: loop header
LB: loop body
LE: loop exit
PB: predicated region body
PF: predicated region fallthrough
CT: control target
= control target key end

     0   :  { %vm19_vm0 = vcmask 125952   ;;  %v141_v5 = vmov 0   ;;  %s205_s0 = inlined_call_operand.vmem [shape: f32[2,4,16], index: 0, kind: input, shape index: {}]   ;;  %s206_s1 = inlined_call_operand.vmem [shape: f32[4,1], index: 1, kind: input, shape index: {}]   ;;  %s207_s2 = inlined_call_operand.vmem [shape: f32[4,1], index: 2, kind: input, shape index: {}]   ;;  %s208_s3 = inlined_call_operand.hbm [shape: f32[2,4,16], index: 3, kind: output, shape index: {}]  }
   0x1   :  { %v168_v0 = vld [vmem:[%s205_s0] sm:$0xf]  ;;  %v173_v1 = vld [vmem:[%s205_s0 + $0x4] sm:$0xf]  ;;  %107 = vset.pattern.permute.xlu1 %v141_v5  ;;  %108 = vset.pattern.permute.xlu0 %v141_v5 }
   0x2   :  { %v17_v2 = vmul.f32 %v168_v0, %v168_v0  ;;  %v18_v3 = vmul.f32 %v173_v1, %v173_v1  ;;  %v65_v4 = vld [vmem:[%s206_s1] sm:$0xf] }
   0x3   :  { %8 = vsyncpa [#allocation3], 0  ;;  %71 = vperm.xlu1 %107, %v65_v4   ;;  %v66_v10 = vld [vmem:[%s207_s2] sm:$0xf]  ;;  %vm48_vm4 = vcmask 130048   ;;  %s142_s1 = smov [#allocation2]  }
   0x4   :  { %v20_v6 = vsel %vm19_vm0, %v17_v2, 0.0  ;;  %v27_v7 = vsel %vm19_vm0, %v18_v3, 0.0  ;;  %s92_s2 = sshll.u32 %s142_s1, 4  ;;  %s93_s2 = int_to_ptr.vmem [resolvable:$true] %s92_s2 }
   0x5   :  { %v21_v8 = vrot.slane %v20_v6, 4  ;;  %v28_v9 = vrot.slane %v27_v7, 4  ;;  %s117_s19 = scalar_lea.vmem %s93_s2, 128  ;;  %p122_p1 = scmp.lt.s32.totalorder %s93_s2, %s93_s2 }
   0x6   :  { %p118_p0 = scmp.ne.s32.totalorder %s93_s2, %s117_s19  ;;  %p123_p2 = scmp.lt.s32.totalorder %s117_s19, %s117_s19 }
   0x7   :  { %v22_v11 = vadd.f32 %v21_v8, %v20_v6  ;;  %v29_v12 = vadd.f32 %v28_v9, %v27_v7  ;;  %78 = vperm.xlu1 %107, %v66_v10  }
   0x8   :  { %p124_p3 = por %p123_p2, %p122_p1 }
   0x9   :  { %v23_v13 = vrot.slane %v22_v11, 2  ;;  %v30_v14 = vrot.slane %v29_v12, 2 }
   0xa   :  { %p125_p4 = pnand %p124_p3, %p118_p0 }
   0xb   :  { %v24_v15 = vadd.f32 %v23_v13, %v22_v11  ;;  %v31_v16 = vadd.f32 %v30_v14, %v29_v12 }
   0xd   :  { %v25_v17 = vrot.slane %v24_v15, 1  ;;  %v32_v18 = vrot.slane %v31_v16, 1 }
   0xf   :  { %v26_v19 = vadd.f32 %v25_v17, %v24_v15  ;;  %v33_v20 = vadd.f32 %v32_v18, %v31_v16 }
  0x11   :  { %109 = vrsqrt.f32 %v26_v19  ;;  %vm36_vm1 = vcmp.eq.f32.partialorder %v26_v19, inf  ;;  %v39_v22 = vand.u32 2147483648, %v26_v19  ;;  %vm38_vm2 = vcmp.eq.f32.partialorder %v26_v19, 0.0 }
  0x12   :  { %111 = vrsqrt.f32 %v33_v20  ;;  %vm43_vm3 = vcmp.eq.f32.partialorder %v33_v20, inf  ;;  %v46_v25 = vand.u32 2147483648, %v33_v20  ;;  %vm45_vm5 = vcmp.eq.f32.partialorder %v33_v20, 0.0 }
  0x1b   :  { %v110_v21 = vpop.eup %109 }
  0x1c   :  { %v112_v23 = vpop.eup %111  ;;  %v35_v24 = vmul.f32 %v110_v21, %v26_v19 }
  0x1d   :  { %v42_v26 = vmul.f32 %v112_v23, %v33_v20 }
  0x1e   :  { %v37_v27 = vsel %vm36_vm1, %v26_v19, %v35_v24 }
  0x1f   :  { %v40_v28 = vsel %vm38_vm2, %v39_v22, %v37_v27  ;;  %v44_v29 = vsel %vm43_vm3, %v33_v20, %v42_v26 }
  0x20   :  { %v49_v30 = vsel %vm48_vm4, %v40_v28, 0.0  ;;  %v47_v31 = vsel %vm45_vm5, %v46_v25, %v44_v29 }
  0x21   :  { %50 = vadd.xlane.f32.xlu0 %v49_v30  ;;  %v52_v32 = vsel %vm48_vm4, %v47_v31, 0.0 }
  0x25   :  { %53 = vadd.xlane.f32.xlu0 %v52_v32 }
  0x82   :  { %v72_v39 = vpop.permute.xlu1 %71 }
  0x86   :  { %v79_v44 = vpop.permute.xlu1 %78 }
  0xae   :  { %v51_v33 = vpop.xlane.xlu0 %50 }
  0xaf   :  { %v55_v34 = vmul.f32 0.0625, %v51_v33 }
  0xb1   :  { %v57_v35 = vadd.f32 1e-08, %v55_v34 }
  0xb2   :  { %v54_v36 = vpop.xlane.xlu0 %53 }
  0xb3   :  { %113 = vrcp.f32 %v57_v35  ;;  %v56_v37 = vmul.f32 0.0625, %v54_v36 }
  0xb5   :  { %v58_v38 = vadd.f32 1e-08, %v56_v37 }
  0xb7   :  { %115 = vrcp.f32 %v58_v38 }
  0xbd   :  { %v114_v40 = vpop.eup %113 }
  0xbe   :  { %v63_v41 = vmul.f32 %v114_v40, %v40_v28 }
  0xc0   :  { %v67_v42 = vmul.f32 %v63_v41, %v168_v0 }
  0xc1   :  { %v116_v43 = vpop.eup %115 }
  0xc2   :  { %v64_v45 = vmul.f32 %v116_v43, %v47_v31  ;;  %v74_v46 = vmul.f32 %v72_v39, %v67_v42 }
  0xc4   :  { %v68_v47 = vmul.f32 %v64_v45, %v173_v1  ;;  %v81_v48 = vadd.f32 %v79_v44, %v74_v46 }
  0xc6   :  { %v75_v49 = vmul.f32 %v72_v39, %v68_v47  ;;  %v83_v50 = vadd.f32 %v81_v48, %v168_v0 }
  0xc8   :  { %v82_v51 = vadd.f32 %v79_v44, %v75_v49  ;;  %85 = vst.msk [vmem:[#allocation2] sm:$0xf] %vm19_vm0, %v83_v50 }
  0xca   :  { %v84_v52 = vadd.f32 %v82_v51, %v173_v1 }
  0xcc   :  { %86 = vst.msk [vmem:[#allocation2 + $0x4] sm:$0xf] %vm19_vm0, %v84_v52 }
  0xcd   :  { %128 = shalt.err (!%p125_p4)
}
  0xce   :  { %s129_s22 = scalar_lea.hbm %s208_s3, 128 }
  0xcf   :  { %p130_p5 = scmp.ne.s32.totalorder %s208_s3, %s129_s22  ;;  %p133_p6 = scmp.lt.u32.totalorder %s129_s22, %s208_s3 }
  0xd1   :  { %p135_p7 = pnand %p133_p6, %p130_p5 }
  0xd3   :  { %138 = shalt.err (!%p135_p7)
}
  0xd4   :  { %s143_s27 = smov 64   ;;  %s144_s28 = smov 4  }
  0xd5   :  { %98 = dma.vmem_to_hbm [thread:$0]  %s93_s2, 128, %s208_s3, [#allocation3], %s143_s27, %s143_s27, %s144_s28  }
  0xd6   :  { %139 = dma.done.wait [#allocation3], 128  }
  0xd7   :  { %140 = vsyncadd [#allocation3], 4294967168 }
  0xd8   :  { %102 = vsyncpa [#allocation3], 1 }

</bundles_post_ra>
